<compile_context>
chip_gen: v7x
topology: tpu7x:2x2x1
jax: 0.10.0
libtpu: 0.0.40
codegen_flags: <defaults>
</compile_context>

<pallas_src>
import jax
import jax.numpy as jnp
from jax import lax
from jax.experimental import pallas as pl
from jax.experimental.pallas import tpu as pltpu


def _self_attn_kernel(xq_ref, kf_ref, kbx_ref, v_ref, gamma_ref, out_ref,
                      attn_ref=None):
    # xq_ref : (1, C, TQ) f32   query tile (channel-major), also the residual
    # kf_ref : (1, C, N ) bf16  K_fold = (Wq^T Wk) x      (hoisted in wrapper)
    # kbx_ref: (1, 1, N ) f32   kb_x   = (Wk^T bq)^T x    (hoisted in wrapper)
    # v_ref  : (1, C, N ) bf16  V      = Wv x + bv        (hoisted in wrapper)
    # gamma  : (1, 1)     f32   scalar in SMEM
    x_q = xq_ref[0]                                       # (C, TQ) f32

    # energy'[i, j] = x_i^T (Wq^T Wk) x_j + (Wk^T bq)^T x_j
    # (row-constant terms dropped: exact under softmax shift-invariance)
    energy = lax.dot_general(x_q.astype(jnp.bfloat16), kf_ref[0],
                             dimension_numbers=(((0,), (0,)), ((), ())),
                             preferred_element_type=jnp.float32)      # (TQ, N)
    energy = energy + kbx_ref[0]                                      # + (1, N)

    # softmax over the key axis — f32 on the VPU, exact divide for the denom
    e_max = jnp.max(energy, axis=-1, keepdims=True)
    p = jnp.exp(energy - e_max)                                       # (TQ, N)
    inv_l = 1.0 / jnp.sum(p, axis=-1, keepdims=True)                  # (TQ, 1)
    # The (TQ,N) normalize is VPU filler in an MXU-bound body; deferring it to
    # a (C,TQ) post-scale would need a (TQ,1)->(1,TQ) relayout, so keep it here.
    attn = p * inv_l                                                  # (TQ, N) f32

    if attn_ref is None:
        attn_mxu = attn.astype(jnp.bfloat16)
    elif attn_ref.dtype == jnp.bfloat16:
        attn_mxu = attn.astype(jnp.bfloat16)   # single cast, reused for the MXU
        attn_ref[0] = attn_mxu
    else:
        attn_ref[0] = attn.astype(attn_ref.dtype)
        attn_mxu = attn.astype(jnp.bfloat16)

    # out[:, i] = sum_j V[:, j] * attn[i, j]  — produced directly in (C, TQ)
    # layout so the residual store stays lane-dense.
    out_cn = lax.dot_general(v_ref[0], attn_mxu,
                             dimension_numbers=(((1,), (1,)), ((), ())),
                             preferred_element_type=jnp.float32)      # (C, TQ)

    out_ref[0] = gamma_ref[0, 0] * out_cn + x_q


def _pick_tq(n, cap=512):
    """Largest multiple of 128 <= cap that divides n; fall back to full n."""
    best = None
    t = 128
    while t <= min(n, cap):
        if n % t == 0:
            best = t
        t += 128
    return best if best is not None else n


def _vmem_capacity_bytes():
    try:
        return int(pltpu.get_tpu_info().vmem_capacity_bytes)
    except Exception:
        return 64 * 1024 * 1024      # conservative default (v7x per-TC VMEM)


def self_attn_pallas(x_nchw, wq, bq, wk, bk, wv, bv, gamma, *,
                     tq=None, attn_dtype=jnp.float32, return_attention=True,
                     vmem_limit_bytes=None):
    """SAGAN Self_Attn forward.

    x_nchw: (B, C, W, H) float32.
    Returns (out (B,C,W,H) f32, attention (B,N,N) attn_dtype) when
    return_attention=True, else just out (the (B,N,N) writeback is the
    dominant HBM store and is skipped entirely in that case).

    attn_dtype=jnp.float32 matches the PyTorch contract; pass jnp.bfloat16 to
    halve the attention writeback.  `bk` only enters through row-constant
    energy terms which cancel under softmax — accepted for API parity, unused.
    """
    B, C, W, H = x_nchw.shape
    N = W * H

    cap_bytes = _vmem_capacity_bytes()
    if vmem_limit_bytes is None:
        # <=48 MiB on 64-MiB chips (v7x), ~96 MiB on 128-MiB chips (v5e/v6e);
        # leaves Mosaic internal-scratch headroom under the physical cap.
        vmem_limit_bytes = min(96 * 1024 * 1024, cap_bytes * 3 // 4)
    if tq is None:
        if cap_bytes >= 128 * 1024 * 1024:                 # v5e / v6e
            tq_cap = 1024
        elif return_attention and attn_dtype == jnp.float32:
            tq_cap = 256                                   # v7x + full f32 attn block
        else:
            tq_cap = 512                                   # v7x, post-hoist
        tq = _pick_tq(N, cap=tq_cap)
    assert N % tq == 0, "query tile must divide N"
    nq = N // tq

    f32 = jnp.float32
    # Channel-major (B, C, N): no transposes on either side.
    x_f32 = x_nchw.reshape(B, C, N).astype(f32)
    wq32 = wq.astype(f32)
    wk32 = wk.astype(f32)
    wv32 = wv.astype(f32)

    # ---- batch-invariant projections, hoisted out of the kernel -------------
    m_mat = wq32.T @ wk32                                              # (C, C)
    k_fold = jnp.einsum('cd,bdn->bcn', m_mat, x_f32).astype(jnp.bfloat16)
    kb = wk32.T @ bq.astype(f32)                                       # (C,)
    kb_x = jnp.einsum('c,bcn->bn', kb, x_f32).reshape(B, 1, N)         # f32
    v_pre = (jnp.einsum('cd,bdn->bcn', wv32, x_f32)
             + bv.astype(f32)[None, :, None]).astype(jnp.bfloat16)     # (B, C, N)
    gamma2 = jnp.asarray(gamma, f32).reshape(1, 1)
    # -------------------------------------------------------------------------

    out_shape = jax.ShapeDtypeStruct((B, C, N), f32)
    out_specs = pl.BlockSpec((1, C, tq), lambda b, q: (b, 0, q))
    if return_attention:
        out_shape = (out_shape, jax.ShapeDtypeStruct((B, N, N), attn_dtype))
        out_specs = [out_specs,
                     pl.BlockSpec((1, tq, N), lambda b, q: (b, q, 0))]

    res = pl.pallas_call(
        _self_attn_kernel,
        out_shape=out_shape,
        grid_spec=pltpu.PrefetchScalarGridSpec(
            num_scalar_prefetch=0,
            # b outermost + constant index_maps: the (1,C,N) blocks are reused
            # (not re-DMA'd) across consecutive q steps.
            grid=(B, nq),
            in_specs=[
                pl.BlockSpec((1, C, tq), lambda b, q: (b, 0, q)),   # x query tile (f32)
                pl.BlockSpec((1, C, N), lambda b, q: (b, 0, 0)),    # K_fold (bf16)
                pl.BlockSpec((1, 1, N), lambda b, q: (b, 0, 0)),    # kb_x   (f32)
                pl.BlockSpec((1, C, N), lambda b, q: (b, 0, 0)),    # V      (bf16)
                pl.BlockSpec(memory_space=pltpu.SMEM),              # gamma scalar
            ],
            out_specs=out_specs,
        ),
        compiler_params=pltpu.CompilerParams(
            dimension_semantics=("parallel", "parallel"),
            vmem_limit_bytes=vmem_limit_bytes),
    )(x_f32, k_fold, kb_x, v_pre, gamma2)

    if return_attention:
        out_cn, attn = res
        return out_cn.reshape(B, C, W, H), attn
    return res.reshape(B, C, W, H)


def self_attn_reference(x_nchw, wq, bq, wk, bk, wv, bv, gamma):
    """Pure-JAX (f32) reference mirroring the PyTorch forward exactly."""
    B, C, W, H = x_nchw.shape
    N = W * H
    xf = x_nchw.reshape(B, C, N)
    q = jnp.einsum('oc,bcn->bon', wq, xf) + bq[None, :, None]   # (B, C//8, N)
    k = jnp.einsum('oc,bcn->bon', wk, xf) + bk[None, :, None]
    v = jnp.einsum('oc,bcn->bon', wv, xf) + bv[None, :, None]   # (B, C, N)
    energy = jnp.einsum('bci,bcj->bij', q, k)                   # (B, N, N)
    attn = jax.nn.softmax(energy, axis=-1)
    out = jnp.einsum('bcj,bij->bci', v, attn)                   # (B, C, N)
    out = out.reshape(B, C, W, H)
    return gamma * out + x_nchw, attn


if __name__ == "__main__":
    key = jax.random.PRNGKey(0)
    B, C, W, H = 2, 32, 16, 16          # in_dim=32 -> C//8 = 4, N = 256
    C8 = C // 8

    keys = jax.random.split(key, 8)
    x = jax.random.normal(keys[0], (B, C, W, H), jnp.float32)
    # 1x1 conv weights: PyTorch shape (out, in, 1, 1) -> stored as (out, in)
    wq = jax.random.normal(keys[1], (C8, C), jnp.float32) * 0.1
    bq = jax.random.normal(keys[2], (C8,), jnp.float32) * 0.1
    wk = jax.random.normal(keys[3], (C8, C), jnp.float32) * 0.1
    bk = jax.random.normal(keys[4], (C8,), jnp.float32) * 0.1
    wv = jax.random.normal(keys[5], (C, C), jnp.float32) * 0.1
    bv = jax.random.normal(keys[6], (C,), jnp.float32) * 0.1
    gamma = jnp.float32(0.5)            # module init is 0; nonzero exercises the path

    out_exp, attn_exp = self_attn_reference(x, wq, bq, wk, bk, wv, bv, gamma)

    # Path 1: module-parity — f32 attention map returned; tq=128 -> grid (2, 2)
    # exercises the query-tiling / block-reuse path.
    out, attn = self_attn_pallas(x, wq, bq, wk, bk, wv, bv, gamma, tq=128)
    out = jax.block_until_ready(out)
    attn = jax.block_until_ready(attn)
    # bf16 MXU operands (folded M, V) -> loose tolerances on the outputs.
    assert jnp.allclose(out, out_exp, atol=3e-2, rtol=3e-2), "out mismatch"
    assert jnp.allclose(attn, attn_exp, atol=5e-3, rtol=5e-2), "attention mismatch"

    # Path 2: attention writeback dropped (dominant HBM store at SAGAN sizes).
    out2 = self_attn_pallas(x, wq, bq, wk, bk, wv, bv, gamma, tq=128,
                            return_attention=False)
    out2 = jax.block_until_ready(out2)
    assert jnp.allclose(out2, out_exp, atol=3e-2, rtol=3e-2), "out (no-attn) mismatch"

    print("KERNEL_OK")
</pallas_src>

<mosaic_0001>
module attributes {stable_mosaic.version = 11 : i64} {
  func.func @_self_attn_kernel(%arg0: i32, %arg1: i32, %arg2: memref<1x32x128xf32, #tpu.memory_space<vmem>>, %arg3: memref<1x32x256xbf16, #tpu.memory_space<vmem>>, %arg4: memref<1x1x256xf32, #tpu.memory_space<vmem>>, %arg5: memref<1x32x256xbf16, #tpu.memory_space<vmem>>, %arg6: memref<1x1xf32, #tpu.memory_space<smem>>, %arg7: memref<1x32x128xf32, #tpu.memory_space<vmem>>, %arg8: memref<1x128x256xf32, #tpu.memory_space<vmem>>) attributes {dimension_semantics = [#tpu.dimension_semantics<parallel>, #tpu.dimension_semantics<parallel>], iteration_bounds = array<i64: 2, 2>, scalar_prefetch = 0 : i64, scratch_operands = 0 : i64, tpu.core_type = #tpu.core_type<tc>, window_params = [{transform_indices = @transform_0, window_bounds = array<i64: 1, 32, 128>}, {transform_indices = @transform_1, window_bounds = array<i64: 1, 32, 256>}, {transform_indices = @transform_2, window_bounds = array<i64: 1, 1, 256>}, {transform_indices = @transform_3, window_bounds = array<i64: 1, 32, 256>}, {transform_indices = @transform_4, window_bounds = array<i64: 1, 1>}, {transform_indices = @transform_5, window_bounds = array<i64: 1, 32, 128>}, {transform_indices = @transform_6, window_bounds = array<i64: 1, 128, 256>}]} {
    %c0 = arith.constant 0 : index
    %c0_0 = arith.constant 0 : index
    %c0_1 = arith.constant 0 : index
    %0 = vector.load %arg2[%c0, %c0_0, %c0_1] : memref<1x32x128xf32, #tpu.memory_space<vmem>>, vector<1x32x128xf32>
    %1 = vector.shape_cast %0 : vector<1x32x128xf32> to vector<32x128xf32>
    %2 = arith.truncf %1 : vector<32x128xf32> to vector<32x128xbf16>
    %c0_2 = arith.constant 0 : index
    %c0_3 = arith.constant 0 : index
    %c0_4 = arith.constant 0 : index
    %3 = vector.load %arg3[%c0_2, %c0_3, %c0_4] : memref<1x32x256xbf16, #tpu.memory_space<vmem>>, vector<1x32x256xbf16>
    %4 = vector.shape_cast %3 : vector<1x32x256xbf16> to vector<32x256xbf16>
    %cst = arith.constant dense<0.000000e+00> : vector<128x256xf32>
    %5 = tpu.matmul %2, %4, %cst {dimension_numbers = #tpu.dot_dimension_numbers<[0], [0], [1], [1], [0, 1, 1, 1], [], []>} : vector<32x128xbf16>, vector<32x256xbf16>, vector<128x256xf32> -> vector<128x256xf32>
    %c0_5 = arith.constant 0 : index
    %c0_6 = arith.constant 0 : index
    %c0_7 = arith.constant 0 : index
    %6 = vector.load %arg4[%c0_5, %c0_6, %c0_7] : memref<1x1x256xf32, #tpu.memory_space<vmem>>, vector<1x1x256xf32>
    %7 = vector.shape_cast %6 : vector<1x1x256xf32> to vector<1x256xf32>
    %8 = vector.broadcast %7 : vector<1x256xf32> to vector<128x256xf32>
    %9 = arith.addf %5, %8 : vector<128x256xf32>
    %cst_8 = arith.constant dense<0xFF800000> : vector<128xf32>
    %10 = vector.multi_reduction <maximumf>, %9, %cst_8 [1] : vector<128x256xf32> to vector<128xf32>
    %11 = vector.shape_cast %10 : vector<128xf32> to vector<128x1xf32>
    %12 = vector.broadcast %11 : vector<128x1xf32> to vector<128x256xf32>
    %13 = arith.subf %9, %12 : vector<128x256xf32>
    %14 = math.exp %13 : vector<128x256xf32>
    %cst_9 = arith.constant dense<0.000000e+00> : vector<128xf32>
    %15 = vector.multi_reduction <add>, %14, %cst_9 [1] : vector<128x256xf32> to vector<128xf32>
    %16 = vector.shape_cast %15 : vector<128xf32> to vector<128x1xf32>
    %cst_10 = arith.constant 1.000000e+00 : f32
    %17 = vector.broadcast %cst_10 : f32 to vector<128x1xf32>
    %18 = arith.divf %17, %16 : vector<128x1xf32>
    %19 = vector.broadcast %18 : vector<128x1xf32> to vector<128x256xf32>
    %20 = arith.mulf %14, %19 : vector<128x256xf32>
    %c0_11 = arith.constant 0 : index
    %c0_12 = arith.constant 0 : index
    %c0_13 = arith.constant 0 : index
    %21 = vector.load %arg8[%c0_11, %c0_12, %c0_13] : memref<1x128x256xf32, #tpu.memory_space<vmem>>, vector<1x128x256xf32>
    %22 = vector.shape_cast %21 : vector<1x128x256xf32> to vector<128x256xf32>
    %23 = vector.shape_cast %20 : vector<128x256xf32> to vector<1x128x256xf32>
    tpu.vector_store %arg8[%c0_11, %c0_12, %c0_13], %23 {strides = array<i32>} : memref<1x128x256xf32, #tpu.memory_space<vmem>>, vector<1x128x256xf32>,
    %24 = arith.truncf %20 : vector<128x256xf32> to vector<128x256xbf16>
    %c0_14 = arith.constant 0 : index
    %c0_15 = arith.constant 0 : index
    %c0_16 = arith.constant 0 : index
    %25 = vector.load %arg5[%c0_14, %c0_15, %c0_16] : memref<1x32x256xbf16, #tpu.memory_space<vmem>>, vector<1x32x256xbf16>
    %26 = vector.shape_cast %25 : vector<1x32x256xbf16> to vector<32x256xbf16>
    %cst_17 = arith.constant dense<0.000000e+00> : vector<32x128xf32>
    %27 = tpu.matmul %26, %24, %cst_17 {dimension_numbers = #tpu.dot_dimension_numbers<[1], [1], [0], [0], [0, 0, 1, 0], [], []>} : vector<32x256xbf16>, vector<128x256xbf16>, vector<32x128xf32> -> vector<32x128xf32>
    %c0_18 = arith.constant 0 : index
    %c0_19 = arith.constant 0 : index
    %28 = memref.load %arg6[%c0_18, %c0_19] : memref<1x1xf32, #tpu.memory_space<smem>>
    %29 = vector.broadcast %28 : f32 to vector<32x128xf32>
    %30 = arith.mulf %29, %27 : vector<32x128xf32>
    %31 = arith.addf %30, %1 : vector<32x128xf32>
    %c0_20 = arith.constant 0 : index
    %c0_21 = arith.constant 0 : index
    %c0_22 = arith.constant 0 : index
    %32 = vector.load %arg7[%c0_20, %c0_21, %c0_22] : memref<1x32x128xf32, #tpu.memory_space<vmem>>, vector<1x32x128xf32>
    %33 = vector.shape_cast %32 : vector<1x32x128xf32> to vector<32x128xf32>
    %34 = vector.shape_cast %31 : vector<32x128xf32> to vector<1x32x128xf32>
    tpu.vector_store %arg7[%c0_20, %c0_21, %c0_22], %34 {strides = array<i32>} : memref<1x32x128xf32, #tpu.memory_space<vmem>>, vector<1x32x128xf32>,
    return
  }
  func.func @transform_0(%arg0: i32, %arg1: i32) -> (i32, i32, i32) {
    %c0_i32 = arith.constant 0 : i32
    %c0_i32_0 = arith.constant 0 : i32
    return %arg0, %c0_i32, %arg1 : i32, i32, i32
  }
  func.func @transform_1(%arg0: i32, %arg1: i32) -> (i32, i32, i32) {
    %c0_i32 = arith.constant 0 : i32
    %c0_i32_0 = arith.constant 0 : i32
    %c0_i32_1 = arith.constant 0 : i32
    return %arg0, %c0_i32, %c0_i32_0 : i32, i32, i32
  }
  func.func @transform_2(%arg0: i32, %arg1: i32) -> (i32, i32, i32) {
    %c0_i32 = arith.constant 0 : i32
    %c0_i32_0 = arith.constant 0 : i32
    %c0_i32_1 = arith.constant 0 : i32
    return %arg0, %c0_i32, %c0_i32_0 : i32, i32, i32
  }
  func.func @transform_3(%arg0: i32, %arg1: i32) -> (i32, i32, i32) {
    %c0_i32 = arith.constant 0 : i32
    %c0_i32_0 = arith.constant 0 : i32
    %c0_i32_1 = arith.constant 0 : i32
    return %arg0, %c0_i32, %c0_i32_0 : i32, i32, i32
  }
  func.func @transform_4(%arg0: i32, %arg1: i32) -> (i32, i32) {
    %c0_i32 = arith.constant 0 : i32
    %c0_i32_0 = arith.constant 0 : i32
    %c0_i32_1 = arith.constant 0 : i32
    return %c0_i32, %c0_i32_0 : i32, i32
  }
  func.func @transform_5(%arg0: i32, %arg1: i32) -> (i32, i32, i32) {
    %c0_i32 = arith.constant 0 : i32
    %c0_i32_0 = arith.constant 0 : i32
    return %arg0, %c0_i32, %arg1 : i32, i32, i32
  }
  func.func @transform_6(%arg0: i32, %arg1: i32) -> (i32, i32, i32) {
    %c0_i32 = arith.constant 0 : i32
    %c0_i32_0 = arith.constant 0 : i32
    return %arg0, %arg1, %c0_i32 : i32, i32, i32
  }
}

</mosaic_0001>

<bundles_post_ra>
// kernel: tpu_custom_call.1
= control target key start
LH: loop header
LB: loop body
LE: loop exit
PB: predicated region body
PF: predicated region fallthrough
CT: control target
= control target key end

     0   :  { %s2545_s0 = inlined_call_operand.hbm [shape: f32[2,32,256], index: 0, kind: input, shape index: {}]   ;;  %s2546_s1 = inlined_call_operand.hbm [shape: bf16[2,32,256], index: 1, kind: input, shape index: {}]   ;;  %s2547_s2 = inlined_call_operand.vmem [shape: f32[2,1,256], index: 2, kind: input, shape index: {}]   ;;  %s2548_s3 = inlined_call_operand.hbm [shape: bf16[2,32,256], index: 3, kind: input, shape index: {}]   ;;  %s2549_s4 = inlined_call_operand.<no memory space> [shape: f32[1,1], index: 4, kind: input, shape index: {}]   ;;  %s2550_s5 = inlined_call_operand.hbm [shape: f32[2,32,256], index: 5, kind: output, shape index: {0}]   ;;  %s2551_s6 = inlined_call_operand.hbm [shape: f32[2,256,256], index: 6, kind: output, shape index: {1}]  }
   0x1   :  { %2580 = sst [smem:[#allocation27_spill]] %s2546_s1 }
   0x2   :  { %2581 = sst [smem:[#allocation28_spill]] %s2547_s2 }
   0x3   :  { %2582 = sst [smem:[#allocation29_spill]] %s2550_s5 }
   0x4   :  { %2583 = sst [smem:[#allocation30_spill]] %s2551_s6 }
   0x5   :  { %12 = sst [smem:[#allocation2]] %s2549_s4 }
   0x6   :  { %13 = vsyncpa [#allocation4], 0 }
   0x7   :  { %15 = vsyncpa [#allocation4 + $0x1], 0 }
   0x8   :  { %16 = vsyncpa [#allocation7], 0 }
   0x9   :  { %18 = vsyncpa [#allocation7 + $0x1], 0 }
   0xa   :  { %19 = vsyncpa [#allocation5], 0 }
   0xb   :  { %21 = vsyncpa [#allocation5 + $0x1], 0 }
   0xc   :  { %22 = vsyncpa [#allocation11], 0 }
   0xd   :  { %24 = vsyncpa [#allocation11 + $0x1], 0  ;;  %s1786_s23 = smov 0   ;;  %s1788_s24 = smov 0  }
   0xe   :  { %s1790_s25 = smov 0   ;;  %s1792_s26 = smov 0  }
   0xf   :  { %s1794_s27 = smov 0   ;;  %s1796_s28 = smov 0  }
  0x10   :  { %s1798_s4 = smov 0   ;;  %s1800_s29 = smov 0  }
  0x11   :  { %s1802_s30 = smov 0   ;;  %s1804_s7 = smov 0  }
  0x12   :  { %s1806_s8 = smov 0  }
  0x13 LB: > { %2584 = sst [smem:[#allocation16_spill]] %s1697_s24  ;;  %s1840_s9 = sadd.s32 4294967295, %s1733_s8   ;;  %s1733_s8 = sphi %s1806_s8, %s30_s8   ;;  %s1729_s7 = sphi %s1804_s7, %s2642_s7   ;;  %s1725_s30 = sphi %s1802_s30, %s2641_s30   ;;  %s1721_s29 = sphi %s1800_s29, %s2640_s29   ;;  %s1717_s4 = sphi %s1798_s4, %s2639_s4   ;;  %s1713_s28 = sphi %s1796_s28, %s2638_s28   ;;  %s1709_s27 = sphi %s1794_s27, %s2637_s27   ;;  %s1705_s26 = sphi %s1792_s26, %s2636_s26   ;;  %s1701_s25 = sphi %s1790_s25, %s2635_s25   ;;  %s1697_s24 = sphi %s1788_s24, %s2634_s24   ;;  %s1693_s23 = sphi %s1786_s23, %s2631_s23  }
  0x14   : > { %2585 = sst [smem:[#allocation17_spill]] %s1705_s26  ;;  %p2555_p0 = scmp.eq.s32.totalorder %s1733_s8, 0 }
  0x15   : > { %2586 = sst [smem:[#allocation18_spill]] %s1717_s4  ;;  %p2554_p1 = scmp.eq.s32.totalorder %s1840_s9, 0 }
  0x16   : > { %2587 = sst [smem:[#allocation19_spill]] %s1721_s29  ;;  %p84_p2 = scmp.ne.s32.totalorder %s1701_s25, %s1697_s24 }
  0x17   : > { %2588 = sst [smem:[#allocation20_spill]] %s1840_s9  ;;  %p90_p3 = scmp.ne.s32.totalorder %s1697_s24, %s1693_s23 }
  0x18   : > { %p86_p4 = por %p84_p2, %p2555_p0  ;;  %p2553_p5 = scmp.lt.s32.totalorder %s1733_s8, 4 }
  0x19   : > { %p1853_p6 = por %p90_p3, %p2554_p1  ;;  %s268_s12 = sand.u32 1, %s1733_s8  }
  0x1a   : > { %s270_s13 = sand.u32 1, %s1701_s25   ;;  %s2552_s15 = sshll.u32 %s1729_s7, 9 }
  0x1b   : > { %s2589_s11 = scalar_select %p1853_p6, 1, 0 }
  0x1c   : > { %s1859_s14 = sshll.u32 %s270_s13, 5  ;;  %s2591_s1 = sld [smem:[#allocation27_spill]] }
  0x1d   : > { %2590 = sst [smem:[#allocation21_spill]] %s2589_s11  ;;  %s272_s19 = scalar_lea.vmem [#allocation6], %s1859_s14 }
  0x1e   : > { %s279_s20 = sshll.u32 %s272_s19, 4  ;;  %p1872_p7 = pnand %p2553_p5, %p86_p4  ;;  %s1877_s20 = int_to_ptr.vmem [resolvable:$true] %s279_s20 }
  0x1f   : > { %s1879_s23 = scalar_lea.sflag [#allocation7], %s268_s12 }
  0x20   : > { %p2557_p9 = pneg %p1872_p7 }
  0x22   : > { %s1867_s18 = scalar_lea.hbm %s2591_s1, %s2552_s15  ;;  %s1490_s19 = scalar_lea.hbm %s2591_s1, 1024 }
  0x23   : > { %s1485_s13 = scalar_lea.hbm %s1867_s18, 512  ;;  %p1491_p12 = scmp.lt.u32.totalorder %s1867_s18, %s2591_s1 }
  0x24   : > { %p1486_p8 = scmp.ne.s32.totalorder %s1867_s18, %s1485_s13  ;;  %p1492_p13 = scmp.lt.u32.totalorder %s1490_s19, %s1485_s13 }
  0x25   : > { %p1494_p3 = scmp.lt.u32.totalorder %s1485_s13, %s1867_s18 }
  0x26   : > { %p1488_p10 = pnand %p2557_p9, %p1486_p8  ;;  %p1493_p2 = por %p1492_p13, %p1491_p12 }
  0x28   : > { %p1489_p11 = pneg %p1488_p10  ;;  %p1495_p4 = por %p1494_p3, %p1493_p2 }
  0x2a   : > { %p1496_p5 = pnand %p1495_p4, %p1489_p11 }
  0x2c   : > { %1499 = shalt.err (!%p1496_p5)
}
  0x2d   : > { %s1500_s12 = scalar_lea.vmem %s1877_s20, 512  ;;  %s1735_s16 = smov [#allocation6]  }
  0x2e   : > { %p1501_p8 = scmp.ne.s32.totalorder %s1877_s20, %s1500_s12  ;;  %s1505_s17 = sshll.u32 %s1735_s16, 4  ;;  %s1506_s17 = int_to_ptr.vmem [resolvable:$false] %s1505_s17 }
  0x2f   : > { %s1507_s10 = scalar_lea.vmem %s1506_s17, 1024  ;;  %p1508_p0 = scmp.lt.s32.totalorder %s1877_s20, %s1506_s17 }
  0x30   : > { %p1503_p10 = pnand %p1501_p8, %p2557_p9  ;;  %p1509_p12 = scmp.lt.s32.totalorder %s1507_s10, %s1500_s12 }
  0x32   : > { %p1504_p1 = pneg %p1503_p10  ;;  %p1510_p13 = por %p1509_p12, %p1508_p0 }
  0x34   : > { %p1511_p2 = pnand %p1510_p13, %p1504_p1 }
  0x36   : > { %1514 = shalt.err (!%p1511_p2)
}
  0x37   : > { %s2558_s15 = smov 128   ;;  %s2560_s13 = smov 8  }
  0x38   : > { %1266 = dma.hbm_to_vmem [thread:$0]  (!%p1872_p7), %s1867_s18, 512, %s1877_s20, %s1879_s23, %s2558_s15, %s2558_s15, %s2560_s13  }
  0x39   : > { %s2593_s19 = sshll.u32 %s1729_s7, 9  ;;  %p1214_p0 = scmp.ge.s32.totalorder %s1733_s8, 1 }
  0x3a   : > { %s1915_s17 = scalar_lea.hbm %s2548_s3, %s2593_s19  ;;  %s300_s10 = scalar_lea.vmem [#allocation8], %s1859_s14 }
  0x3b   : > { %s1919_s22 = sshll.u32 %s300_s10, 4  ;;  %p315_p1 = scmp.lt.s32.totalorder %s1733_s8, 5  ;;  %s1992_s22 = int_to_ptr.vmem [resolvable:$true] %s1919_s22 }
  0x3c   : > { %s1202_s5 = sadd.s32 4294967294, %s1733_s8   ;;  %s39_s18 = sadd.s32 1, %s1725_s30 }
  0x3d   : > { %p1922_p5 = pnand %p1214_p0, %p315_p1  ;;  %s51_s20 = sadd.s32 1, %s1713_s28 }
  0x3e   : > { %p40_p11 = scmp.ge.s32.totalorder %s39_s18, 2  ;;  %p58_p3 = scmp.ne.s32.totalorder %s1713_s28, %s1709_s27 }
  0x3f   : > { %s2594_s1 = scalar_select %p1922_p5, 1, 0 }
  0x40   : > { %p64_p4 = scmp.ne.s32.totalorder %s1709_s27, %s1705_s26  ;;  %p189_p8 = scmp.eq.s32.totalorder %s1840_s9, 3 }
  0x41   : > { %s2644_s18 = smov (%p40_p11, %s39_s18), 0  ;;  %s2596_s14 = sadd.s32 1, %s1729_s7 }
  0x42   : > { %2595 = sst [smem:[#allocation22_spill]] %s2644_s18  ;;  %s2646_s14 = smov (!%p40_p11, %s2596_s14), %s1729_s7 }
  0x43   : > { %s47_s19 = ssub.s32 %s1725_s30, %s2644_s18  ;;  %p2597_p10 = scmp.eq.s32.totalorder %s1733_s8, 0 }
  0x44   : > { %p44_p13 = scmp.ge.s32.totalorder %s2646_s14, 2  ;;  %p2599_p2 = scmp.eq.s32.totalorder %s1840_s9, 0 }
  0x45   : > { %p1943_p12 = por %p2597_p10, %p58_p3  ;;  %p1953_p1 = por %p189_p8, %p58_p3 }
  0x46   : > { %p1949_p0 = por %p2599_p2, %p64_p4  ;;  %p195_p11 = scmp.eq.s32.totalorder %s1202_s5, 3 }
  0x47   : > { %s2602_s10 = scalar_select %p1953_p1, 1, 0 }
  0x48   : > { %s2600_s16 = scalar_select %p1949_p0, 1, 0 }
  0x49   : > { %2603 = sst [smem:[#allocation24_spill]] %s2602_s10  ;;  %s2648_s14 = smov (%p44_p13, %s2646_s14), 0 }
  0x4a   : > { %2601 = sst [smem:[#allocation23_spill]] %s2600_s16  ;;  %p1959_p9 = por %p195_p11, %p64_p4 }
  0x4b   : > { %2604 = sst [smem:[#allocation25_spill]] %s2648_s14  ;;  %s246_s13 = sand.u32 1, %s1713_s28  }
  0x4c   : > { %s2605_s15 = scalar_select %p1959_p9, 1, 0 }
  0x4d   : > { %s46_s18 = ssub.s32 %s1729_s7, %s2648_s14  ;;  %s1205_s6 = sshll.u32 %s246_s13, 5 }
  0x4e   : > { %2606 = sst [smem:[#allocation26_spill]] %s2605_s15  ;;  %s48_s26 = sor.u32 %s47_s19, %s46_s18 }
  0x4f   : > { %p75_p10 = scmp.eq.s32.totalorder %s46_s18, 0  ;;  %p49_p2 = scmp.eq.s32.totalorder %s48_s26, 0 }
  0x50   : > { %s2607_s4 = sadd.s32 1, %s1701_s25  ;;  %s1206_s10 = sshll.u32 %s1729_s7, 3 }
  0x51   : > { %s1969_s2 = scalar_select %p75_p10, %s1701_s25, %s2607_s4  }
  0x52   : > { %s1972_s5 = scalar_select %p49_p2, %s1713_s28, %s51_s20  }
  0x53   : > { %s255_s29 = sadd.s32 %s1725_s30, %s1206_s10  ;;  %s250_s11 = scalar_lea.vmem [#allocation3], %s1205_s6 }
  0x54   : > { %s258_s24 = sshll.u32 %s250_s11, 4  ;;  %s1207_s9 = sshll.u32 %s255_s29, 7  ;;  %s1976_s24 = int_to_ptr.vmem [resolvable:$true] %s258_s24 }
  0x55   : > { %s1981_s14 = scalar_lea.hbm %s2545_s0, %s1207_s9  ;;  %p2608_p3 = scmp.lt.s32.totalorder %s1733_s8, 4 }
  0x56   : > { %s1994_s6 = scalar_lea.sflag [#allocation4], %s246_s13  ;;  %s1515_s4 = scalar_lea.hbm %s1981_s14, 512 }
  0x57   : > { %p1987_p4 = pnand %p2608_p3, %p1943_p12  ;;  %p1516_p8 = scmp.ne.s32.totalorder %s1981_s14, %s1515_s4 }
  0x58   : > { %s1520_s11 = scalar_lea.hbm %s2545_s0, 2048  ;;  %p1521_p12 = scmp.lt.u32.totalorder %s1981_s14, %s2545_s0 }
  0x59   : > { %p1517_p13 = pneg %p1987_p4  ;;  %p1522_p2 = scmp.lt.u32.totalorder %s1520_s11, %s1515_s4 }
  0x5a   : > { %p1524_p9 = scmp.lt.u32.totalorder %s1515_s4, %s1981_s14 }
  0x5b   : > { %p1518_p11 = pnand %p1517_p13, %p1516_p8  ;;  %p1523_p3 = por %p1522_p2, %p1521_p12 }
  0x5d   : > { %p1519_p10 = pneg %p1518_p11  ;;  %p1525_p1 = por %p1524_p9, %p1523_p3 }
  0x5f   : > { %p1526_p6 = pnand %p1525_p1, %p1519_p10 }
  0x61   : > { %1529 = shalt.err (!%p1526_p6)
}
  0x62   : > { %s1530_s13 = scalar_lea.vmem %s1976_s24, 512  ;;  %s1738_s20 = smov [#allocation3]  }
  0x63   : > { %p1531_p8 = scmp.ne.s32.totalorder %s1976_s24, %s1530_s13  ;;  %s1535_s19 = sshll.u32 %s1738_s20, 4  ;;  %s1536_s19 = int_to_ptr.vmem [resolvable:$false] %s1535_s19 }
  0x64   : > { %s1537_s12 = scalar_lea.vmem %s1536_s19, 1024  ;;  %p1538_p5 = scmp.lt.s32.totalorder %s1976_s24, %s1536_s19 }
  0x65   : > { %p1533_p11 = pnand %p1531_p8, %p1517_p13  ;;  %p1539_p12 = scmp.lt.s32.totalorder %s1537_s12, %s1530_s13 }
  0x67   : > { %p1534_p0 = pneg %p1533_p11  ;;  %p1540_p2 = por %p1539_p12, %p1538_p5 }
  0x69   : > { %p1541_p9 = pnand %p1540_p2, %p1534_p0 }
  0x6b   : > { %1544 = shalt.err (!%p1541_p9)
}
  0x6c   : > { %s1739_s16 = smov 256   ;;  %s2610_s10 = smov 8  }
  0x6d   : > { %s2611_s4 = smov 128   ;;  %s1545_s29 = scalar_lea.hbm %s1915_s17, 512 }
  0x6e   : > { %1263 = dma.hbm_to_vmem [thread:$0]  (!%p1987_p4), %s1981_s14, 512, %s1976_s24, %s1994_s6, %s1739_s16, %s2611_s4, %s2610_s10  }
  0x6f   : > { %p1546_p6 = scmp.ne.s32.totalorder %s1915_s17, %s1545_s29  ;;  %p2612_p5 = pneg %p1872_p7 }
  0x70   : > { %s1550_s26 = scalar_lea.hbm %s2548_s3, 1024  ;;  %p1551_p13 = scmp.lt.u32.totalorder %s1915_s17, %s2548_s3 }
  0x71   : > { %p1548_p0 = pnand %p1546_p6, %p2612_p5  ;;  %p1552_p10 = scmp.lt.u32.totalorder %s1550_s26, %s1545_s29 }
  0x72   : > { %p1554_p8 = scmp.lt.u32.totalorder %s1545_s29, %s1915_s17 }
  0x73   : > { %p1549_p1 = pneg %p1548_p0  ;;  %p1553_p3 = por %p1552_p10, %p1551_p13 }
  0x75   : > { %p1555_p11 = por %p1554_p8, %p1553_p3 }
  0x77   : > { %p1556_p12 = pnand %p1555_p11, %p1549_p1 }
  0x79   : > { %1559 = shalt.err (!%p1556_p12)
}
  0x7a   : > { %s1560_s24 = scalar_lea.vmem %s1992_s22, 512  ;;  %p2613_p2 = pmov %p2612_p5 }
  0x7b   : > { %p1561_p4 = scmp.ne.s32.totalorder %s1992_s22, %s1560_s24  ;;  %s1740_s14 = smov [#allocation8]  }
  0x7c   : > { %s1565_s6 = sshll.u32 %s1740_s14, 4  ;;  %s1566_s6 = int_to_ptr.vmem [resolvable:$false] %s1565_s6 }
  0x7d   : > { %p1563_p9 = pnand %p1561_p4, %p2613_p2  ;;  %s1567_s13 = scalar_lea.vmem %s1566_s6, 1024 }
  0x7e   : > { %p1568_p5 = scmp.lt.s32.totalorder %s1992_s22, %s1566_s6  ;;  %p1569_p0 = scmp.lt.s32.totalorder %s1567_s13, %s1560_s24 }
  0x7f   : > { %p1564_p6 = pneg %p1563_p9 }
  0x80   : > { %p1570_p13 = por %p1569_p0, %p1568_p5 }
  0x82   : > { %p1571_p10 = pnand %p1570_p13, %p1564_p6 }
  0x84   : > { %1574 = shalt.err (!%p1571_p10)
}
  0x85   : > { %1269 = dma.hbm_to_vmem [thread:$0]  (!%p1872_p7), %s1915_s17, 512, %s1992_s22, %s1879_s23, %s2611_s4, %s2611_s4, %s2610_s10  }
  0x86   : > { %p2614_p1 = scmp.ne.s32.totalorder %s2594_s1, 0 }
  0x87   : > { %s2615_s20 = sld [smem:[#allocation23_spill]] (!%p2614_p1)  ;;  %s2054_s19 = sand.u32 (!%p2614_p1), 1, %s1709_s27  }
  0x88   : > { %319 = sbr.rel (%p2614_p1) target bundleno = 1104 (0x450), region = 40  ;;  %s1215_s12 = sshll.u32 (!%p2614_p1), %s2054_s19, 5 }
  0x89   : > { %s322_s16 = scalar_lea.sflag (!%p2614_p1), [#allocation4], %s2054_s19  ;;  %s2060_s21 = scalar_lea.vmem (!%p2614_p1), [#allocation3], %s1215_s12 }
  0x8d   : > { %p2616_p3 = scmp.ne.s32.totalorder (!%p2614_p1), %s2615_s20, 0 }
  0x8f   : > { %1676 = dma.done.wait (%p2616_p3), %s322_s16, 512  }
  0x90   : > { %1678 = vsyncadd (%p2616_p3), %s322_s16, 4294966784  ;;  %s2617_s22 = sld [smem:[#allocation20_spill]]  ;;  %s2618_s1 = sld [smem:[#allocation16_spill]] }
  0x91   : > { %s2619_s23 = sld [smem:[#allocation21_spill]] }
  0x96   : > { %s330_s17 = sand.u32 1, %s2617_s22   ;;  %s332_s10 = sand.u32 1, %s2618_s1  }
  0x97   : > { %s2068_s4 = sshll.u32 %s332_s10, 5  ;;  %s331_s29 = scalar_lea.sflag [#allocation7], %s330_s17 }
  0x98   : > { %s334_s9 = scalar_lea.vmem [#allocation6], %s2068_s4  ;;  %p2620_p7 = scmp.ne.s32.totalorder %s2619_s23, 0 }
  0x9a   : > { %1680 = dma.done.wait (%p2620_p7), %s331_s29, 1024  }
  0x9b   : > { %1682 = vsyncadd (%p2620_p7), %s331_s29, 4294966272  ;;  %v1741_v0 = vmov 0   ;;  %v2076_v1 = vld [vmem:[%s2060_s21] sm:$0xff]  ;;  %v2079_v2 = vld [vmem:[%s2060_s21 + $0x8] sm:$0xff]  ;;  %vm455_vm0 = vcmask 261120   ;;  %s2621_s11 = sld [smem:[#allocation19_spill]]  ;;  %v409_v19 = vlaneseq }
  0x9c   : > { %512 = vmatprep.mubr.bf16.mxu0 %v1741_v0  ;;  %v399_v3 = vld [vmem:[%s2060_s21 + $0x10] sm:$0xff]  ;;  %v401_v4 = vpack.c.bf16 %v2079_v2, %v2076_v1  ;;  %v400_v5 = vld [vmem:[%s2060_s21 + $0x18] sm:$0xff]  ;;  %v1375_v6 = vld [vmem:[%s334_s9 + $0x4] ss:$8 sps:$4 sm:$0xff]   ;;  %s2622_s14 = sld [smem:[#allocation28_spill]]  ;;  %s2359_s13 = scalar_lea.vmem [#allocation8], %s2068_s4 }
  0x9d   : > { %v1377_v7 = vld [vmem:[%s334_s9] ss:$8 sps:$4 sm:$0xff]   ;;  %v402_v8 = vpack.c.bf16 %v400_v5, %v399_v3  ;;  %v1378_v9 = vld [vmem:[%s334_s9 + $0x14] ss:$8 sps:$4 sm:$0xff]   ;;  %480 = vmatprep.subr.bf16.mxu0 %v1375_v6  ;;  %v1380_v10 = vld [vmem:[%s334_s9 + $0x10] ss:$8 sps:$4 sm:$0xff]  }
  0x9e   : > { %419 = vxpose.xlu0.c.b16.start [1/2] (short) %v401_v4, 128  ;;  %481 = vmatpush1.bf16.msra.mxu0 %v1377_v7  ;;  %v410_v20 = vshrl.u32 %v409_v19, 7  ;;  %s1219_s20 = sshll.u32 %s2054_s19, 8  ;;  %s2623_s22 = sld [smem:[#allocation18_spill]] }
  0x9f   : > { %482 = vmatprep.subr.bf16.mxu0 %v1378_v9  ;;  %s2365_s16 = scalar_lea.vmem [#allocation10], %s1219_s20  ;;  %s2624_s1 = sld [smem:[#allocation24_spill]] }
  0xa0   : > { %v411_v21 = vsub.s32 0, %v410_v20  ;;  %v415_v23 = vsub.s32 1, %v410_v20  ;;  %s1023_s29 = sshll.u32 %s2365_s16, 4  ;;  %s990_s24 = scalar_lea.sflag [#allocation11], %s2054_s19  ;;  %s2440_s29 = int_to_ptr.vmem [resolvable:$true] %s1023_s29 }
  0xa1   : > { %p391_p8 = scmp.lt.s32.totalorder %s2621_s11, 1  ;;  %s1243_s17 = sshll.u32 %s2621_s11, 6 }
  0xa2   : > { %420 = vxpose.xlu0.c.b16.end [2/2] (short) %v402_v8, 128  ;;  %483 = vmatpush1.bf16.msra.mxu0 %v1380_v10 }
  0xa3   : > { %s392_s26 = scalar_select %p391_p8, %s2621_s11, 1 }
  0xa4   : > { %s1249_s23 = sshll.u32 %s2623_s22, 5 }
  0xa5   : > { %s1220_s15 = sshll.u32 %s392_s26, 1  ;;  %s1020_s10 = sadd.s32 %s1249_s23, %s1243_s17 }
  0xa6   : > { %s394_s6 = scalar_lea.vmem %s2622_s14, %s1220_s15  ;;  %s1244_s4 = sshll.u32 %s1020_s10, 7 }
  0xa7   : > { %v407_v22 = vld [vmem:[%s394_s6] sm:$0x3]  ;;  %s2625_s15 = sld [smem:[#allocation30_spill]]  ;;  %s1575_s14 = scalar_lea.vmem %s2440_s29, 4096 }
  0xa8   : > { %v2098_v24 = vrot.slane %v407_v22, %v411_v21  ;;  %v2100_v25 = vrot.slane %v407_v22, %v415_v23  ;;  %p1576_p11 = scmp.ne.s32.totalorder %s2440_s29, %s1575_s14  ;;  %p2626_p12 = scmp.ne.s32.totalorder %s2624_s1, 0 }
  0xa9   : > { %s1742_s6 = smov [#allocation10]  }
  0xaa   : > { %p1577_p4 = pnand %p1576_p11, %p2626_p12 }
  0xac   : > { %p1578_p2 = pneg %p1577_p4 }
  0xad   : > { %s2438_s18 = scalar_lea.hbm %s2625_s15, %s1244_s4 }
 0x104   : > { %v427_v11 = vpop.trf.xlu0 }
 0x105   : > { %1225 = vmatmul.mubr.msk.bf16.vlgmr.msra.gmra.mrb[0].mxu0 %vm455_vm0, %v427_v11 }
 0x106   : > { %522 = vmatprep.mubr.bf16.mxu0 %v1741_v0 }
 0x108   : > { %v428_v12 = vpop.trf.xlu0 }
 0x10c   : > { %v429_v13 = vpop.trf.xlu0 }
 0x10d   : > { %1226 = vmatmul.mubr.msk.bf16.gmra.mrb[4].mxu0 %vm455_vm0, %v428_v12 }
 0x10e   : > { %532 = vmatprep.mubr.bf16.mxu0 %v1741_v0 }
 0x110   : > { %v430_v14 = vpop.trf.xlu0 }
 0x114   : > { %v431_v15 = vpop.trf.xlu0 }
 0x115   : > { %1227 = vmatmul.mubr.msk.bf16.gmra.mrb[8].mxu0 %vm455_vm0, %v429_v13 }
 0x116   : > { %542 = vmatprep.mubr.bf16.mxu0 %v1741_v0 }
 0x118   : > { %v432_v16 = vpop.trf.xlu0 }
 0x11c   : > { %v433_v17 = vpop.trf.xlu0 }
 0x11d   : > { %1228 = vmatmul.mubr.msk.bf16.gmra.mrb[12].mxu0 %vm455_vm0, %v430_v14 }
 0x11e   : > { %552 = vmatprep.mubr.bf16.mxu0 %v1741_v0 }
 0x120   : > { %v434_v18 = vpop.trf.xlu0 }
 0x125   : > { %1229 = vmatmul.mubr.msk.bf16.gmra.mrb[16].mxu0 %vm455_vm0, %v431_v15 }
 0x126   : > { %562 = vmatprep.mubr.bf16.mxu0 %v1741_v0 }
 0x12d   : > { %1230 = vmatmul.mubr.msk.bf16.gmra.mrb[20].mxu0 %vm455_vm0, %v432_v16 }
 0x12e   : > { %572 = vmatprep.mubr.bf16.mxu0 %v1741_v0 }
 0x135   : > { %1231 = vmatmul.mubr.msk.bf16.gmra.mrb[24].mxu0 %vm455_vm0, %v433_v17 }
 0x136   : > { %582 = vmatprep.mubr.bf16.mxu0 %v1741_v0 }
 0x13d   : > { %1232 = vmatmul.mubr.msk.bf16.gmra.mrb[28].mxu0 %vm455_vm0, %v434_v18 }
 0x1d8   : > { %v514_v26 = vpop.f32.mrb[0].mxu0 }
 0x1d9   : > { %v2103_v27 = vadd.f32 %v514_v26, %v2098_v24  ;;  %v516_v28 = vpop.f32.mrb[1].mxu0 }
 0x1da   : > { %v2106_v29 = vadd.f32 %v516_v28, %v2100_v25  ;;  %v518_v30 = vpop.f32.mrb[2].mxu0 }
 0x1db   : > { %v520_v31 = vpop.f32.mrb[3].mxu0  ;;  %v2109_v32 = vadd.f32 %v518_v30, %v2098_v24 }
 0x1dc   : > { %v2112_v33 = vadd.f32 %v520_v31, %v2100_v25  ;;  %v593_v34 = vmax.f32 %v2103_v27, %v2106_v29 }
 0x1de   : > { %594 = vmax.xlane.f32.xlu1 %v593_v34  ;;  %v596_v36 = vmax.f32 %v2109_v32, %v2112_v33 }
 0x1e0   : > { %v524_v35 = vpop.f32.mrb[4].mxu0 }
 0x1e1   : > { %v2119_v37 = vadd.f32 %v524_v35, %v2098_v24  ;;  %v526_v38 = vpop.f32.mrb[5].mxu0 }
 0x1e2   : > { %v2122_v39 = vadd.f32 %v526_v38, %v2100_v25  ;;  %597 = vmax.xlane.f32.xlu1 %v596_v36  ;;  %v528_v40 = vpop.f32.mrb[6].mxu0 }
 0x1e3   : > { %v2125_v41 = vadd.f32 %v528_v40, %v2098_v24  ;;  %v530_v42 = vpop.f32.mrb[7].mxu0 }
 0x1e4   : > { %v2128_v43 = vadd.f32 %v530_v42, %v2100_v25  ;;  %v599_v44 = vmax.f32 %v2119_v37, %v2122_v39 }
 0x1e6   : > { %600 = vmax.xlane.f32.xlu0 %v599_v44  ;;  %v602_v45 = vmax.f32 %v2125_v41, %v2128_v43 }
 0x1e8   : > { %603 = vmax.xlane.f32.xlu1 %v602_v45  ;;  %v534_v46 = vpop.f32.mrb[8].mxu0 }
 0x1e9   : > { %v2135_v47 = vadd.f32 %v534_v46, %v2098_v24  ;;  %v536_v48 = vpop.f32.mrb[9].mxu0 }
 0x1ea   : > { %v2138_v49 = vadd.f32 %v536_v48, %v2100_v25  ;;  %v538_v50 = vpop.f32.mrb[10].mxu0 }
 0x1eb   : > { %v540_v51 = vpop.f32.mrb[11].mxu0  ;;  %v2141_v52 = vadd.f32 %v538_v50, %v2098_v24 }
 0x1ec   : > { %v2144_v53 = vadd.f32 %v540_v51, %v2100_v25  ;;  %v605_v54 = vmax.f32 %v2135_v47, %v2138_v49 }
 0x1ee   : > { %606 = vmax.xlane.f32.xlu1 %v605_v54  ;;  %v608_v56 = vmax.f32 %v2141_v52, %v2144_v53 }
 0x1f0   : > { %v544_v55 = vpop.f32.mrb[12].mxu0 }
 0x1f1   : > { %v2151_v57 = vadd.f32 %v544_v55, %v2098_v24  ;;  %v546_v58 = vpop.f32.mrb[13].mxu0 }
 0x1f2   : > { %v2154_v59 = vadd.f32 %v546_v58, %v2100_v25  ;;  %609 = vmax.xlane.f32.xlu1 %v608_v56  ;;  %v548_v60 = vpop.f32.mrb[14].mxu0 }
 0x1f3   : > { %v550_v61 = vpop.f32.mrb[15].mxu0  ;;  %v2157_v62 = vadd.f32 %v548_v60, %v2098_v24 }
 0x1f4   : > { %v2160_v63 = vadd.f32 %v550_v61, %v2100_v25  ;;  %v611_v0 = vmax.f32 %v2151_v57, %v2154_v59 }
 0x1f6   : > { %612 = vmax.xlane.f32.xlu1 %v611_v0  ;;  %v614_v4 = vmax.f32 %v2157_v62, %v2160_v63 }
 0x1f8   : > { %v554_v3 = vpop.f32.mrb[16].mxu0 }
 0x1f9   : > { %v2167_v5 = vadd.f32 %v554_v3, %v2098_v24  ;;  %v556_v6 = vpop.f32.mrb[17].mxu0 }
 0x1fa   : > { %v2170_v7 = vadd.f32 %v556_v6, %v2100_v25  ;;  %615 = vmax.xlane.f32.xlu1 %v614_v4  ;;  %v558_v8 = vpop.f32.mrb[18].mxu0 }
 0x1fb   : > { %v560_v9 = vpop.f32.mrb[19].mxu0  ;;  %v2173_v10 = vadd.f32 %v558_v8, %v2098_v24 }
 0x1fc   : > { %v2176_v11 = vadd.f32 %v560_v9, %v2100_v25  ;;  %v617_v12 = vmax.f32 %v2167_v5, %v2170_v7 }
 0x1fe   : > { %618 = vmax.xlane.f32.xlu1 %v617_v12  ;;  %v620_v14 = vmax.f32 %v2173_v10, %v2176_v11 }
 0x200   : > { %v564_v13 = vpop.f32.mrb[20].mxu0 }
 0x201   : > { %v2183_v15 = vadd.f32 %v564_v13, %v2098_v24  ;;  %v566_v16 = vpop.f32.mrb[21].mxu0 }
 0x202   : > { %v2186_v17 = vadd.f32 %v566_v16, %v2100_v25  ;;  %621 = vmax.xlane.f32.xlu1 %v620_v14  ;;  %v568_v18 = vpop.f32.mrb[22].mxu0 }
 0x203   : > { %v570_v19 = vpop.f32.mrb[23].mxu0  ;;  %v2189_v20 = vadd.f32 %v568_v18, %v2098_v24 }
 0x204   : > { %v2192_v21 = vadd.f32 %v570_v19, %v2100_v25  ;;  %v623_v22 = vmax.f32 %v2183_v15, %v2186_v17 }
 0x206   : > { %624 = vmax.xlane.f32.xlu1 %v623_v22  ;;  %v626_v26 = vmax.f32 %v2189_v20, %v2192_v21 }
 0x208   : > { %v574_v23 = vpop.f32.mrb[24].mxu0 }
 0x209   : > { %v2199_v28 = vadd.f32 %v574_v23, %v2098_v24  ;;  %v576_v30 = vpop.f32.mrb[25].mxu0 }
 0x20a   : > { %v2202_v31 = vadd.f32 %v576_v30, %v2100_v25  ;;  %627 = vmax.xlane.f32.xlu1 %v626_v26  ;;  %v578_v34 = vpop.f32.mrb[26].mxu0 }
 0x20b   : > { %v2205_v35 = vadd.f32 %v578_v34, %v2098_v24  ;;  %v580_v36 = vpop.f32.mrb[27].mxu0 }
 0x20c   : > { %v2208_v38 = vadd.f32 %v580_v36, %v2100_v25  ;;  %v629_v40 = vmax.f32 %v2199_v28, %v2202_v31 }
 0x20e   : > { %630 = vmax.xlane.f32.xlu1 %v629_v40  ;;  %v632_v42 = vmax.f32 %v2205_v35, %v2208_v38 }
 0x210   : > { %633 = vmax.xlane.f32.xlu0 %v632_v42  ;;  %v584_v44 = vpop.f32.mrb[28].mxu0 }
 0x211   : > { %v2215_v45 = vadd.f32 %v584_v44, %v2098_v24  ;;  %v586_v46 = vpop.f32.mrb[29].mxu0 }
 0x212   : > { %v2218_v48 = vadd.f32 %v586_v46, %v2100_v25  ;;  %v588_v50 = vpop.f32.mrb[30].mxu0 }
 0x213   : > { %v2221_v51 = vadd.f32 %v588_v50, %v2098_v24  ;;  %v590_v54 = vpop.f32.mrb[31].mxu0 }
 0x214   : > { %v2224_v55 = vadd.f32 %v590_v54, %v2100_v25  ;;  %v635_v56 = vmax.f32 %v2215_v45, %v2218_v48 }
 0x216   : > { %636 = vmax.xlane.f32.xlu1 %v635_v56  ;;  %v638_v58 = vmax.f32 %v2221_v51, %v2224_v55 }
 0x218   : > { %639 = vmax.xlane.f32.xlu0 %v638_v58 }
 0x26b   : > { %v595_v60 = vpop.xlane.xlu1 %594 }
 0x26c   : > { %v641_v61 = vsub.f32 %v2103_v27, %v595_v60  ;;  %v642_v0 = vsub.f32 %v2106_v29, %v595_v60 }
 0x26e   : > { %v673_v3 = vmul.f32 1.442695, %v641_v61  ;;  %v675_v24 = vmul.f32 1.442695, %v642_v0 }
 0x26f   : > { %v598_v4 = vpop.xlane.xlu1 %597 }
 0x270   : > { %1387 = vpow2.f32 %v673_v3  ;;  %v643_v25 = vsub.f32 %v2109_v32, %v598_v4  ;;  %v644_v6 = vsub.f32 %v2112_v33, %v598_v4 }
 0x271   : > { %1389 = vpow2.f32 %v675_v24 }
 0x272   : > { %v677_v8 = vmul.f32 1.442695, %v643_v25  ;;  %v679_v9 = vmul.f32 1.442695, %v644_v6 }
 0x273   : > { %v601_v12 = vpop.xlane.xlu0 %600 }
 0x274   : > { %1391 = vpow2.f32 %v677_v8  ;;  %v645_v13 = vsub.f32 %v2119_v37, %v601_v12  ;;  %v646_v14 = vsub.f32 %v2122_v39, %v601_v12 }
 0x275   : > { %1393 = vpow2.f32 %v679_v9  ;;  %v604_v27 = vpop.xlane.xlu1 %603 }
 0x276   : > { %v681_v29 = vmul.f32 1.442695, %v645_v13  ;;  %v683_v16 = vmul.f32 1.442695, %v646_v14  ;;  %v647_v18 = vsub.f32 %v2125_v41, %v604_v27  ;;  %v648_v19 = vsub.f32 %v2128_v43, %v604_v27 }
 0x278   : > { %1395 = vpow2.f32 %v681_v29  ;;  %v685_v32 = vmul.f32 1.442695, %v647_v18  ;;  %v687_v33 = vmul.f32 1.442695, %v648_v19 }
 0x279   : > { %1397 = vpow2.f32 %v683_v16 }
 0x27a   : > { %v2238_v22 = vpop.eup %1387  ;;  %1399 = vpow2.f32 %v685_v32 }
 0x27b   : > { %v2240_v23 = vpop.eup %1389  ;;  %1401 = vpow2.f32 %v687_v33  ;;  %v607_v37 = vpop.xlane.xlu1 %606 }
 0x27c   : > { %v649_v39 = vsub.f32 %v2135_v47, %v607_v37  ;;  %v650_v26 = vsub.f32 %v2138_v49, %v607_v37  ;;  %v737_v41 = vadd.f32 %v2240_v23, %v2238_v22 }
 0x27e   : > { %v2246_v30 = vpop.eup %1391  ;;  %v689_v43 = vmul.f32 1.442695, %v649_v39  ;;  %v691_v34 = vmul.f32 1.442695, %v650_v26  ;;  %738 = vadd.xlane.f32.xlu1 %v737_v41 }
 0x27f   : > { %v2248_v36 = vpop.eup %1393  ;;  %v610_v40 = vpop.xlane.xlu1 %609 }
 0x280   : > { %1403 = vpow2.f32 %v689_v43  ;;  %v651_v42 = vsub.f32 %v2141_v52, %v610_v40  ;;  %v652_v44 = vsub.f32 %v2144_v53, %v610_v40  ;;  %v740_v47 = vadd.f32 %v2248_v36, %v2246_v30 }
 0x281   : > { %1405 = vpow2.f32 %v691_v34 }
 0x282   : > { %v2254_v49 = vpop.eup %1395  ;;  %v693_v46 = vmul.f32 1.442695, %v651_v42  ;;  %v695_v50 = vmul.f32 1.442695, %v652_v44  ;;  %741 = vadd.xlane.f32.xlu0 %v740_v47 }
 0x283   : > { %v2256_v54 = vpop.eup %1397  ;;  %v613_v56 = vpop.xlane.xlu1 %612 }
 0x284   : > { %v2258_v58 = vpop.eup %1399  ;;  %1407 = vpow2.f32 %v693_v46  ;;  %v653_v60 = vsub.f32 %v2151_v57, %v613_v56  ;;  %v654_v52 = vsub.f32 %v2154_v59, %v613_v56  ;;  %v743_v53 = vadd.f32 %v2256_v54, %v2254_v49 }
 0x285   : > { %v2264_v61 = vpop.eup %1401  ;;  %1409 = vpow2.f32 %v695_v50 }
 0x286   : > { %v697_v0 = vmul.f32 1.442695, %v653_v60  ;;  %v699_v3 = vmul.f32 1.442695, %v654_v52  ;;  %744 = vadd.xlane.f32.xlu1 %v743_v53  ;;  %v746_v24 = vadd.f32 %v2264_v61, %v2258_v58 }
 0x287   : > { %v616_v4 = vpop.xlane.xlu1 %615 }
 0x288   : > { %1411 = vpow2.f32 %v697_v0  ;;  %v655_v25 = vsub.f32 %v2157_v62, %v616_v4  ;;  %v656_v57 = vsub.f32 %v2160_v63, %v616_v4  ;;  %747 = vadd.xlane.f32.xlu0 %v746_v24 }
 0x289   : > { %1413 = vpow2.f32 %v699_v3 }
 0x28a   : > { %v2270_v59 = vpop.eup %1403  ;;  %v701_v6 = vmul.f32 1.442695, %v655_v25  ;;  %v703_v8 = vmul.f32 1.442695, %v656_v57 }
 0x28b   : > { %v2272_v9 = vpop.eup %1405  ;;  %v619_v12 = vpop.xlane.xlu1 %618 }
 0x28c   : > { %1415 = vpow2.f32 %v701_v6  ;;  %v657_v13 = vsub.f32 %v2167_v5, %v619_v12  ;;  %v658_v14 = vsub.f32 %v2170_v7, %v619_v12  ;;  %v749_v27 = vadd.f32 %v2272_v9, %v2270_v59 }
 0x28d   : > { %1417 = vpow2.f32 %v703_v8 }
 0x28e   : > { %v2278_v62 = vpop.eup %1407  ;;  %v705_v63 = vmul.f32 1.442695, %v657_v13  ;;  %v707_v29 = vmul.f32 1.442695, %v658_v14  ;;  %750 = vadd.xlane.f32.xlu1 %v749_v27 }
 0x28f   : > { %v2280_v16 = vpop.eup %1409  ;;  %v622_v18 = vpop.xlane.xlu1 %621 }
 0x290   : > { %1419 = vpow2.f32 %v705_v63  ;;  %v659_v19 = vsub.f32 %v2173_v10, %v622_v18  ;;  %v660_v32 = vsub.f32 %v2176_v11, %v622_v18  ;;  %v752_v5 = vadd.f32 %v2280_v16, %v2278_v62 }
 0x291   : > { %1421 = vpow2.f32 %v707_v29 }
 0x292   : > { %v2286_v7 = vpop.eup %1411  ;;  %v709_v33 = vmul.f32 1.442695, %v659_v19  ;;  %v711_v37 = vmul.f32 1.442695, %v660_v32  ;;  %753 = vadd.xlane.f32.xlu0 %v752_v5 }
 0x293   : > { %v2288_v39 = vpop.eup %1413  ;;  %v625_v26 = vpop.xlane.xlu1 %624 }
 0x294   : > { %1423 = vpow2.f32 %v709_v33  ;;  %v661_v41 = vsub.f32 %v2183_v15, %v625_v26  ;;  %v662_v43 = vsub.f32 %v2186_v17, %v625_v26  ;;  %v755_v10 = vadd.f32 %v2288_v39, %v2286_v7 }
 0x295   : > { %1425 = vpow2.f32 %v711_v37 }
 0x296   : > { %v2294_v11 = vpop.eup %1415  ;;  %v713_v34 = vmul.f32 1.442695, %v661_v41  ;;  %v715_v40 = vmul.f32 1.442695, %v662_v43  ;;  %756 = vadd.xlane.f32.xlu1 %v755_v10 }
 0x297   : > { %v2296_v42 = vpop.eup %1417  ;;  %v628_v44 = vpop.xlane.xlu1 %627 }
 0x298   : > { %1427 = vpow2.f32 %v713_v34  ;;  %v663_v47 = vsub.f32 %v2189_v20, %v628_v44  ;;  %v664_v46 = vsub.f32 %v2192_v21, %v628_v44  ;;  %v758_v15 = vadd.f32 %v2296_v42, %v2294_v11 }
 0x299   : > { %1429 = vpow2.f32 %v715_v40 }
 0x29a   : > { %v2302_v17 = vpop.eup %1419  ;;  %v717_v50 = vmul.f32 1.442695, %v663_v47  ;;  %v719_v56 = vmul.f32 1.442695, %v664_v46  ;;  %759 = vadd.xlane.f32.xlu0 %v758_v15 }
 0x29b   : > { %v2304_v60 = vpop.eup %1421  ;;  %v631_v52 = vpop.xlane.xlu1 %630 }
 0x29c   : > { %1431 = vpow2.f32 %v717_v50  ;;  %v665_v53 = vsub.f32 %v2199_v28, %v631_v52  ;;  %v666_v0 = vsub.f32 %v2202_v31, %v631_v52  ;;  %v761_v20 = vadd.f32 %v2304_v60, %v2302_v17  ;;  %v1383_v50 = vld [vmem:[%s2359_s13 + $0x4] ss:$8 sps:$4 sm:$0xff]  }
 0x29d   : > { %1433 = vpow2.f32 %v719_v56  ;;  %v634_v21 = vpop.xlane.xlu0 %633  ;;  %953 = vmatprep.mubr.bf16.mxu1 %v1383_v50 }
 0x29e   : > { %v2310_v3 = vpop.eup %1423  ;;  %v721_v24 = vmul.f32 1.442695, %v665_v53  ;;  %v723_v4 = vmul.f32 1.442695, %v666_v0  ;;  %762 = vadd.xlane.f32.xlu1 %v761_v20  ;;  %v667_v25 = vsub.f32 %v2205_v35, %v634_v21  ;;  %v668_v57 = vsub.f32 %v2208_v38, %v634_v21 }
 0x29f   : > { %v2314_v6 = vpop.eup %1425 }
 0x2a0   : > { %1435 = vpow2.f32 %v721_v24  ;;  %v725_v28 = vmul.f32 1.442695, %v667_v25  ;;  %v727_v8 = vmul.f32 1.442695, %v668_v57  ;;  %v764_v31 = vadd.f32 %v2314_v6, %v2310_v3 }
 0x2a1   : > { %1437 = vpow2.f32 %v723_v4 }
 0x2a2   : > { %v2318_v12 = vpop.eup %1427  ;;  %1439 = vpow2.f32 %v725_v28  ;;  %765 = vadd.xlane.f32.xlu0 %v764_v31 }
 0x2a3   : > { %v2320_v13 = vpop.eup %1429  ;;  %1441 = vpow2.f32 %v727_v8  ;;  %v637_v14 = vpop.xlane.xlu1 %636 }
 0x2a4   : > { %v669_v35 = vsub.f32 %v2215_v45, %v637_v14  ;;  %v670_v38 = vsub.f32 %v2218_v48, %v637_v14  ;;  %v767_v27 = vadd.f32 %v2320_v13, %v2318_v12 }
 0x2a5   : > { %v640_v63 = vpop.xlane.xlu0 %639 }
 0x2a6   : > { %v2326_v29 = vpop.eup %1431  ;;  %v729_v18 = vmul.f32 1.442695, %v669_v35  ;;  %v731_v19 = vmul.f32 1.442695, %v670_v38  ;;  %768 = vadd.xlane.f32.xlu1 %v767_v27  ;;  %v671_v32 = vsub.f32 %v2221_v51, %v640_v63  ;;  %v672_v5 = vsub.f32 %v2224_v55, %v640_v63 }
 0x2a7   : > { %v2330_v33 = vpop.eup %1433 }
 0x2a8   : > { %1443 = vpow2.f32 %v729_v18  ;;  %v733_v37 = vmul.f32 1.442695, %v671_v32  ;;  %v735_v45 = vmul.f32 1.442695, %v672_v5  ;;  %v770_v48 = vadd.f32 %v2330_v33, %v2326_v29 }
 0x2a9   : > { %1445 = vpow2.f32 %v731_v19 }
 0x2aa   : > { %v2334_v26 = vpop.eup %1435  ;;  %1447 = vpow2.f32 %v733_v37  ;;  %771 = vadd.xlane.f32.xlu0 %v770_v48 }
 0x2ab   : > { %v2336_v41 = vpop.eup %1437  ;;  %1449 = vpow2.f32 %v735_v45 }
 0x2ac   : > { %v2338_v51 = vpop.eup %1439  ;;  %v773_v55 = vadd.f32 %v2336_v41, %v2334_v26 }
 0x2ad   : > { %v2342_v43 = vpop.eup %1441 }
 0x2ae   : > { %774 = vadd.xlane.f32.xlu1 %v773_v55  ;;  %v776_v10 = vadd.f32 %v2342_v43, %v2338_v51 }
 0x2b0   : > { %777 = vadd.xlane.f32.xlu0 %v776_v10 }
 0x2b2   : > { %v2346_v34 = vpop.eup %1443 }
 0x2b3   : > { %v2348_v40 = vpop.eup %1445 }
 0x2b4   : > { %v2350_v44 = vpop.eup %1447  ;;  %v779_v47 = vadd.f32 %v2348_v40, %v2346_v34 }
 0x2b5   : > { %v2354_v46 = vpop.eup %1449 }
 0x2b6   : > { %780 = vadd.xlane.f32.xlu1 %v779_v47  ;;  %v782_v15 = vadd.f32 %v2354_v46, %v2350_v44 }
 0x2b8   : > { %783 = vadd.xlane.f32.xlu0 %v782_v15 }
 0x30b   : > { %v739_v56 = vpop.xlane.xlu1 %738 }
 0x30c   : > { %1451 = vrcp.f32 %v739_v56 }
 0x30f   : > { %v742_v52 = vpop.xlane.xlu0 %741 }
 0x310   : > { %1453 = vrcp.f32 %v742_v52 }
 0x313   : > { %v745_v53 = vpop.xlane.xlu1 %744 }
 0x314   : > { %1455 = vrcp.f32 %v745_v53 }
 0x315   : > { %v748_v0 = vpop.xlane.xlu0 %747 }
 0x316   : > { %v1452_v20 = vpop.eup %1451  ;;  %1457 = vrcp.f32 %v748_v0 }
 0x317   : > { %v818_v21 = vmul.f32 %v1452_v20, %v2240_v23  ;;  %v817_v24 = vmul.f32 %v1452_v20, %v2238_v22 }
 0x319   : > { %850 = vst [vmem:[%s2365_s16 + $0x8] sm:$0xff] %v818_v21  ;;  %849 = vst [vmem:[%s2365_s16] sm:$0xff] %v817_v24 }
 0x31a   : > { %v1454_v4 = vpop.eup %1453 }
 0x31b   : > { %v751_v25 = vpop.xlane.xlu1 %750  ;;  %v820_v57 = vmul.f32 %v1454_v4, %v2248_v36  ;;  %v819_v28 = vmul.f32 %v1454_v4, %v2246_v30 }
 0x31c   : > { %1459 = vrcp.f32 %v751_v25 }
 0x31d   : > { %852 = vst [vmem:[%s2365_s16 + $0x18] sm:$0xff] %v820_v57  ;;  %v882_v23 = vpack.c.bf16 %v820_v57, %v818_v21  ;;  %851 = vst [vmem:[%s2365_s16 + $0x10] sm:$0xff] %v819_v28  ;;  %v881_v22 = vpack.c.bf16 %v819_v28, %v817_v24 }
 0x31e   : > { %v1456_v8 = vpop.eup %1455 }
 0x31f   : > { %921 = vmatprep.subr.bf16.mxu1 %v882_v23  ;;  %v754_v31 = vpop.xlane.xlu0 %753  ;;  %v822_v14 = vmul.f32 %v1456_v8, %v2256_v54  ;;  %v821_v35 = vmul.f32 %v1456_v8, %v2254_v49 }
 0x320   : > { %v1458_v38 = vpop.eup %1457  ;;  %1461 = vrcp.f32 %v754_v31  ;;  %922 = vmatpush1.bf16.xpose.msra.mxu1 %v881_v22 }
 0x321   : > { %v824_v30 = vmul.f32 %v1458_v38, %v2264_v61  ;;  %854 = vst [vmem:[%s2365_s16 + $0x28] sm:$0xff] %v822_v14  ;;  %v823_v36 = vmul.f32 %v1458_v38, %v2258_v58  ;;  %853 = vst [vmem:[%s2365_s16 + $0x20] sm:$0xff] %v821_v35 }
 0x323   : > { %v757_v27 = vpop.xlane.xlu1 %756  ;;  %856 = vst [vmem:[%s2365_s16 + $0x38] sm:$0xff] %v824_v30  ;;  %v884_v63 = vpack.c.bf16 %v824_v30, %v822_v14  ;;  %855 = vst [vmem:[%s2365_s16 + $0x30] sm:$0xff] %v823_v36  ;;  %v883_v49 = vpack.c.bf16 %v823_v36, %v821_v35 }
 0x324   : > { %1463 = vrcp.f32 %v757_v27 }
 0x325   : > { %923 = vmatprep.subr.bf16.mxu1 %v884_v63  ;;  %v1384_v63 = vld [vmem:[%s2359_s13 + $0x14] ss:$8 sps:$4 sm:$0xff]  }
 0x326   : > { %v1460_v54 = vpop.eup %1459 }
 0x327   : > { %v760_v18 = vpop.xlane.xlu0 %759  ;;  %v826_v19 = vmul.f32 %v1460_v54, %v2272_v9  ;;  %v825_v61 = vmul.f32 %v1460_v54, %v2270_v59 }
 0x328   : > { %1465 = vrcp.f32 %v760_v18  ;;  %924 = vmatpush1.bf16.xpose.msra.mxu1 %v883_v49 }
 0x329   : > { %858 = vst [vmem:[%s2365_s16 + $0x48] sm:$0xff] %v826_v19  ;;  %857 = vst [vmem:[%s2365_s16 + $0x40] sm:$0xff] %v825_v61 }
 0x32a   : > { %v1462_v58 = vpop.eup %1461 }
 0x32b   : > { %v763_v32 = vpop.xlane.xlu1 %762  ;;  %v828_v5 = vmul.f32 %v1462_v58, %v2280_v16  ;;  %v827_v37 = vmul.f32 %v1462_v58, %v2278_v62 }
 0x32c   : > { %1467 = vrcp.f32 %v763_v32 }
 0x32d   : > { %860 = vst [vmem:[%s2365_s16 + $0x58] sm:$0xff] %v828_v5  ;;  %v886_v45 = vpack.c.bf16 %v828_v5, %v826_v19  ;;  %859 = vst [vmem:[%s2365_s16 + $0x50] sm:$0xff] %v827_v37  ;;  %v885_v9 = vpack.c.bf16 %v827_v37, %v825_v61 }
 0x32e   : > { %v1464_v48 = vpop.eup %1463 }
 0x32f   : > { %925 = vmatprep.subr.bf16.mxu1 %v886_v45  ;;  %v766_v59 = vpop.xlane.xlu0 %765  ;;  %v830_v55 = vmul.f32 %v1464_v48, %v2288_v39  ;;  %v829_v10 = vmul.f32 %v1464_v48, %v2286_v7 }
 0x330   : > { %1469 = vrcp.f32 %v766_v59  ;;  %926 = vmatpush1.bf16.xpose.msra.mxu1 %v885_v9 }
 0x331   : > { %862 = vst [vmem:[%s2365_s16 + $0x68] sm:$0xff] %v830_v55  ;;  %861 = vst [vmem:[%s2365_s16 + $0x60] sm:$0xff] %v829_v10 }
 0x332   : > { %v1466_v16 = vpop.eup %1465 }
 0x333   : > { %v769_v62 = vpop.xlane.xlu1 %768  ;;  %v832_v47 = vmul.f32 %v1466_v16, %v2296_v42  ;;  %v831_v15 = vmul.f32 %v1466_v16, %v2294_v11 }
 0x334   : > { %1471 = vrcp.f32 %v769_v62 }
 0x335   : > { %864 = vst [vmem:[%s2365_s16 + $0x78] sm:$0xff] %v832_v47  ;;  %v888_v50 = vpack.c.bf16 %v832_v47, %v830_v55  ;;  %863 = vst [vmem:[%s2365_s16 + $0x70] sm:$0xff] %v831_v15  ;;  %v887_v56 = vpack.c.bf16 %v831_v15, %v829_v10 }
 0x336   : > { %v1468_v39 = vpop.eup %1467 }
 0x337   : > { %927 = vmatprep.subr.bf16.mxu1 %v888_v50  ;;  %v772_v7 = vpop.xlane.xlu0 %771  ;;  %v834_v52 = vmul.f32 %v1468_v39, %v2304_v60  ;;  %v833_v53 = vmul.f32 %v1468_v39, %v2302_v17 }
 0x338   : > { %1473 = vrcp.f32 %v772_v7  ;;  %928 = vmatpush1.bf16.xpose.msra.mxu1 %v887_v56 }
 0x339   : > { %866 = vst [vmem:[%s2365_s16 + $0x88] sm:$0xff] %v834_v52  ;;  %865 = vst [vmem:[%s2365_s16 + $0x80] sm:$0xff] %v833_v53 }
 0x33a   : > { %v1470_v42 = vpop.eup %1469 }
 0x33b   : > { %v775_v11 = vpop.xlane.xlu1 %774  ;;  %v836_v0 = vmul.f32 %v1470_v42, %v2314_v6  ;;  %v835_v20 = vmul.f32 %v1470_v42, %v2310_v3 }
 0x33c   : > { %1475 = vrcp.f32 %v775_v11 }
 0x33d   : > { %v778_v21 = vpop.xlane.xlu0 %777  ;;  %868 = vst [vmem:[%s2365_s16 + $0x98] sm:$0xff] %v836_v0  ;;  %v890_v24 = vpack.c.bf16 %v836_v0, %v834_v52  ;;  %867 = vst [vmem:[%s2365_s16 + $0x90] sm:$0xff] %v835_v20  ;;  %v889_v60 = vpack.c.bf16 %v835_v20, %v833_v53 }
 0x33e   : > { %v1472_v17 = vpop.eup %1471  ;;  %1477 = vrcp.f32 %v778_v21 }
 0x33f   : > { %929 = vmatprep.subr.bf16.mxu1 %v890_v24  ;;  %v838_v4 = vmul.f32 %v1472_v17, %v2320_v13  ;;  %v837_v25 = vmul.f32 %v1472_v17, %v2318_v12 }
 0x340   : > { %930 = vmatpush1.bf16.xpose.msra.mxu1 %v889_v60 }
 0x341   : > { %870 = vst [vmem:[%s2365_s16 + $0xa8] sm:$0xff] %v838_v4  ;;  %869 = vst [vmem:[%s2365_s16 + $0xa0] sm:$0xff] %v837_v25 }
 0x342   : > { %v1474_v6 = vpop.eup %1473 }
 0x343   : > { %v781_v3 = vpop.xlane.xlu1 %780  ;;  %v840_v57 = vmul.f32 %v1474_v6, %v2330_v33  ;;  %v839_v28 = vmul.f32 %v1474_v6, %v2326_v29 }
 0x344   : > { %1479 = vrcp.f32 %v781_v3 }
 0x345   : > { %v784_v23 = vpop.xlane.xlu0 %783  ;;  %872 = vst [vmem:[%s2365_s16 + $0xb8] sm:$0xff] %v840_v57  ;;  %v892_v22 = vpack.c.bf16 %v840_v57, %v838_v4  ;;  %871 = vst [vmem:[%s2365_s16 + $0xb0] sm:$0xff] %v839_v28  ;;  %v891_v13 = vpack.c.bf16 %v839_v28, %v837_v25 }
 0x346   : > { %v1476_v12 = vpop.eup %1475  ;;  %1481 = vrcp.f32 %v784_v23 }
 0x347   : > { %931 = vmatprep.subr.bf16.mxu1 %v892_v22  ;;  %v842_v8 = vmul.f32 %v1476_v12, %v2336_v41  ;;  %v841_v31 = vmul.f32 %v1476_v12, %v2334_v26 }
 0x348   : > { %v1478_v33 = vpop.eup %1477  ;;  %932 = vmatpush1.bf16.xpose.msra.mxu1 %v891_v13 }
 0x349   : > { %v844_v29 = vmul.f32 %v1478_v33, %v2342_v43  ;;  %874 = vst [vmem:[%s2365_s16 + $0xc8] sm:$0xff] %v842_v8  ;;  %v843_v14 = vmul.f32 %v1478_v33, %v2338_v51  ;;  %873 = vst [vmem:[%s2365_s16 + $0xc0] sm:$0xff] %v841_v31 }
 0x34b   : > { %876 = vst [vmem:[%s2365_s16 + $0xd8] sm:$0xff] %v844_v29  ;;  %v894_v35 = vpack.c.bf16 %v844_v29, %v842_v8  ;;  %875 = vst [vmem:[%s2365_s16 + $0xd0] sm:$0xff] %v843_v14  ;;  %v893_v41 = vpack.c.bf16 %v843_v14, %v841_v31 }
 0x34d   : > { %933 = vmatprep.subr.bf16.mxu1 %v894_v35 }
 0x34e   : > { %v1480_v38 = vpop.eup %1479 }
 0x34f   : > { %v846_v26 = vmul.f32 %v1480_v38, %v2348_v40  ;;  %v845_v30 = vmul.f32 %v1480_v38, %v2346_v34  ;;  %v1381_v34 = vld [vmem:[%s2359_s13] ss:$8 sps:$4 sm:$0xff]  }
 0x350   : > { %v1482_v43 = vpop.eup %1481  ;;  %934 = vmatpush1.bf16.xpose.msra.mxu1 %v893_v41 }
 0x351   : > { %v848_v51 = vmul.f32 %v1482_v43, %v2354_v46  ;;  %878 = vst [vmem:[%s2365_s16 + $0xe8] sm:$0xff] %v846_v26  ;;  %v847_v36 = vmul.f32 %v1482_v43, %v2350_v44  ;;  %877 = vst [vmem:[%s2365_s16 + $0xe0] sm:$0xff] %v845_v30  ;;  %v1386_v46 = vld [vmem:[%s2359_s13 + $0x10] ss:$8 sps:$4 sm:$0xff]   ;;  %s1579_s13 = sshll.u32 %s1742_s6, 4  ;;  %s1580_s13 = int_to_ptr.vmem [resolvable:$false] %s1579_s13 }
 0x352   : > { %s1581_s20 = scalar_lea.vmem %s1580_s13, 8192  ;;  %p1582_p9 = scmp.lt.s32.totalorder %s2440_s29, %s1580_s13 }
 0x353   : > { %880 = vst [vmem:[%s2365_s16 + $0xf8] sm:$0xff] %v848_v51  ;;  %v896_v27 = vpack.c.bf16 %v848_v51, %v846_v26  ;;  %879 = vst [vmem:[%s2365_s16 + $0xf0] sm:$0xff] %v847_v36  ;;  %v895_v40 = vpack.c.bf16 %v847_v36, %v845_v30  ;;  %p1583_p6 = scmp.lt.s32.totalorder %s1581_s20, %s1575_s14 }
 0x355   : > { %935 = vmatprep.subr.bf16.mxu1 %v896_v27  ;;  %p1584_p5 = por %p1583_p6, %p1582_p9 }
 0x357   : > { %p1585_p0 = pnand %p1584_p5, %p1578_p2 }
 0x358   : > { %936 = vmatpush1.bf16.xpose.msra.mxu1 %v895_v40 }
 0x35f   : > { %954 = vmatmul.mubr.bf16.vlgmr.msra.gmra.mrb[0].mxu1 %v1381_v34 }
 0x360   : > { %961 = vmatprep.mubr.bf16.mxu1 %v1384_v63 }
 0x367   : > { %962 = vmatmul.mubr.bf16.gmra.mrb[4].mxu1 %v1386_v46 }
 0x368   : > { %1588 = shalt.err (!%p1585_p0)
}
 0x369   : > { %s1589_s16 = scalar_lea.hbm %s2438_s18, 4096  ;;  %s1593_s10 = scalar_lea.hbm %s2625_s15, 16384 }
 0x36a   : > { %p1590_p13 = scmp.ne.s32.totalorder %s2438_s18, %s1589_s16  ;;  %p1594_p3 = scmp.lt.u32.totalorder %s2438_s18, %s2625_s15 }
 0x36b   : > { %p1595_p7 = scmp.lt.u32.totalorder %s1593_s10, %s1589_s16  ;;  %p1597_p11 = scmp.lt.u32.totalorder %s1589_s16, %s2438_s18 }
 0x36c   : > { %p1591_p10 = pnand %p1590_p13, %p2626_p12 }
 0x36d   : > { %p1596_p8 = por %p1595_p7, %p1594_p3 }
 0x36e   : > { %p1592_p1 = pneg %p1591_p10 }
 0x36f   : > { %p1598_p4 = por %p1597_p11, %p1596_p8 }
 0x371   : > { %p1599_p2 = pnand %p1598_p4, %p1592_p1 }
 0x373   : > { %1602 = shalt.err (!%p1599_p2)
}
 0x374   : > { %s1743_s26 = smov 256   ;;  %s1744_s14 = smov 16   ;;  %v1483_v48 = vld [vmem:[%s2060_s21 + $0x10] sm:$0xff]  ;;  %v1484_v10 = vld [vmem:[%s2060_s21 + $0x18] sm:$0xff] }
 0x375   : > { %1257 = dma.vmem_to_hbm [thread:$0]  (%p2626_p12), %s2440_s29, 4096, %s2438_s18, %s990_s24, %s1743_s26, %s1743_s26, %s1744_s14  }
 0x376   : > { %s970_s6 = sld [smem:[#allocation2]]  ;;  %s1239_s13 = sshll.u32 %s2621_s11, 3 }
 0x377   : > { %s383_s20 = scalar_lea.vmem [#allocation9], %s1215_s12  ;;  %s1001_s16 = sadd.s32 %s2623_s22, %s1239_s13 }
 0x378   : > { %s1004_s29 = sshll.u32 %s383_s20, 4  ;;  %s1240_s18 = sshll.u32 %s1001_s16, 7  ;;  %s2474_s29 = int_to_ptr.vmem [resolvable:$true] %s1004_s29 }
 0x379   : > { %s2627_s22 = sld [smem:[#allocation29_spill]]  ;;  %s985_s23 = scalar_lea.sflag [#allocation5], %s2054_s19 }
 0x37a   : > { %s1603_s17 = scalar_lea.vmem %s2474_s29, 512  ;;  %s1745_s10 = smov [#allocation9]  }
 0x37b   : > { %p1604_p9 = scmp.ne.s32.totalorder %s2474_s29, %s1603_s17  ;;  %s1607_s4 = sshll.u32 %s1745_s10, 4  ;;  %s1608_s4 = int_to_ptr.vmem [resolvable:$false] %s1607_s4 }
 0x37c   : > { %v971_v44 = vstv %s970_s6  ;;  %s1609_s9 = scalar_lea.vmem %s1608_s4, 1024  ;;  %p1610_p0 = scmp.lt.s32.totalorder %s2474_s29, %s1608_s4 }
 0x37d   : > { %p1605_p6 = pnand %p1604_p9, %p2626_p12  ;;  %p1611_p13 = scmp.lt.s32.totalorder %s1609_s9, %s1603_s17 }
 0x37f   : > { %s2480_s24 = scalar_lea.hbm %s2627_s22, %s1240_s18  ;;  %p1606_p5 = pneg %p1605_p6 }
 0x380   : > { %p1612_p10 = por %p1611_p13, %p1610_p0 }
 0x382   : > { %p1613_p1 = pnand %p1612_p10, %p1606_p5 }
 0x432   : > { %v955_v54 = vpop.f32.mrb[0].mxu1 }
 0x433   : > { %v972_v49 = vmul.f32 %v971_v44, %v955_v54  ;;  %v957_v18 = vpop.f32.mrb[1].mxu1 }
 0x434   : > { %v958_v19 = vpop.f32.mrb[2].mxu1 }
 0x435   : > { %v976_v61 = vadd.f32 %v972_v49, %v2076_v1  ;;  %v973_v58 = vmul.f32 %v971_v44, %v958_v19  ;;  %v960_v32 = vpop.f32.mrb[3].mxu1 }
 0x437   : > { %980 = vst [vmem:[%s383_s20] sm:$0xff] %v976_v61  ;;  %v977_v5 = vadd.f32 %v973_v58, %v2079_v2 }
 0x439   : > { %981 = vst [vmem:[%s383_s20 + $0x8] sm:$0xff] %v977_v5 }
 0x43a   : > { %v963_v37 = vpop.f32.mrb[4].mxu1 }
 0x43b   : > { %v974_v45 = vmul.f32 %v971_v44, %v963_v37  ;;  %v965_v9 = vpop.f32.mrb[5].mxu1 }
 0x43c   : > { %v966_v1 = vpop.f32.mrb[6].mxu1 }
 0x43d   : > { %v978_v59 = vadd.f32 %v1483_v48, %v974_v45  ;;  %v975_v55 = vmul.f32 %v971_v44, %v966_v1  ;;  %v968_v2 = vpop.f32.mrb[7].mxu1 }
 0x43f   : > { %982 = vst [vmem:[%s383_s20 + $0x10] sm:$0xff] %v978_v59  ;;  %v979_v16 = vadd.f32 %v1484_v10, %v975_v55 }
 0x441   : > { %983 = vst [vmem:[%s383_s20 + $0x18] sm:$0xff] %v979_v16 }
 0x442   : > { %1616 = shalt.err (!%p1613_p1)
}
 0x443   : > { %s1617_s21 = scalar_lea.hbm %s2480_s24, 512  ;;  %s1621_s13 = scalar_lea.hbm %s2627_s22, 2048 }
 0x444   : > { %p1618_p3 = scmp.ne.s32.totalorder %s2480_s24, %s1617_s21  ;;  %p1622_p11 = scmp.lt.u32.totalorder %s2480_s24, %s2627_s22 }
 0x445   : > { %p1623_p4 = scmp.lt.u32.totalorder %s1621_s13, %s1617_s21  ;;  %p1625_p9 = scmp.lt.u32.totalorder %s1617_s21, %s2480_s24 }
 0x446   : > { %p1619_p7 = pnand %p1618_p3, %p2626_p12 }
 0x447   : > { %p1624_p2 = por %p1623_p4, %p1622_p11 }
 0x448   : > { %p1620_p8 = pneg %p1619_p7 }
 0x449   : > { %p1626_p6 = por %p1625_p9, %p1624_p2 }
 0x44b   : > { %p1627_p5 = pnand %p1626_p6, %p1620_p8 }
 0x44d   : > { %1630 = shalt.err (!%p1627_p5)
}
 0x44e   : > { %s1746_s18 = smov 128   ;;  %s1747_s12 = smov 8  }
 0x44f   : > { %1256 = dma.vmem_to_hbm [thread:$0]  (%p2626_p12), %s2474_s29, 512, %s2480_s24, %s985_s23, %s1746_s18, %s1743_s26, %s1747_s12  }
 0x450 PF: > { %s2628_s11 = sld [smem:[#allocation17_spill]]  ;;  %s2629_s17 = sld [smem:[#allocation26_spill]] }
 0x451   : > { %p1278_p0 = scmp.ge.s32.totalorder %s1733_s8, 2 }
 0x456   : > { %s1038_s10 = sand.u32 1, %s2628_s11   ;;  %p2630_p13 = scmp.ne.s32.totalorder %s2629_s17, 0 }
 0x457   : > { %s1039_s4 = scalar_lea.sflag [#allocation5], %s1038_s10 }
 0x458   : > { %p1271_p10 = pnand %p1278_p0, %p2630_p13 }
 0x45a   : > { %1684 = dma.done.wait (!%p1271_p10), %s1039_s4, 512  }
 0x45b   : > { %1686 = vsyncadd (!%p1271_p10), %s1039_s4, 4294966784  ;;  %s1048_s9 = scalar_lea.sflag [#allocation11], %s1038_s10 }
 0x45c   : > { %1688 = dma.done.wait (!%p1271_p10), %s1048_s9, 4096  }
 0x45d   : > { %1690 = vsyncadd (!%p1271_p10), %s1048_s9, 4294963200  ;;  %s30_s8 = sadd.s32 1, %s1733_s8   ;;  %s2631_s23 = sld [smem:[#allocation16_spill]] }
 0x45e   : > { %p27_p1 = scmp.ge.s32.totalorder %s30_s8, 6   ;;  %s2632_s19 = sld [smem:[#allocation22_spill]] }
 0x45f   : > { %s2633_s1 = sld [smem:[#allocation25_spill]]  ;;  %s2634_s24 = smov %s1701_s25 }
 0x460   : > { %s2635_s25 = smov %s1969_s2  ;;  %s2636_s26 = smov %s1709_s27 }
 0x461   : > { %s2637_s27 = smov %s1713_s28  ;;  %s2638_s28 = smov %s1972_s5 }
 0x462   : > { %s2639_s4 = smov %s1725_s30  ;;  %s2640_s29 = smov %s1729_s7 }
 0x463   :  { %29 = sbr.rel (!%p27_p1) target bundleno = 19 (0x13), region = 129 }
 0x464   : > { %s2641_s30 = smov %s2632_s19 }
 0x465   : > { %s2642_s7 = smov %s2633_s1 }
 0x46a   :  { %1053 = vsyncpa [#allocation4], 1 }
 0x46b   :  { %1055 = vsyncpa [#allocation4 + $0x1], 1 }
 0x46c   :  { %1056 = vsyncpa [#allocation7], 1 }
 0x46d   :  { %1058 = vsyncpa [#allocation7 + $0x1], 1 }
 0x46e   :  { %1059 = vsyncpa [#allocation5], 1 }
 0x46f   :  { %1061 = vsyncpa [#allocation5 + $0x1], 1 }
 0x470   :  { %1062 = vsyncpa [#allocation11], 1 }
 0x471   :  { %1064 = vsyncpa [#allocation11 + $0x1], 1 }

</bundles_post_ra>
